<compile_context>
chip_gen: v7x
topology: tpu7x:2x2x1
jax: 0.10.0
libtpu: 0.0.40
codegen_flags: <defaults>
</compile_context>

<pallas_src>
import functools

import jax
import jax.numpy as jnp
from jax.experimental import pallas as pl
from jax.experimental.pallas import tpu as pltpu

_SQRT_2_OVER_PI = 0.7978845608028654


def _gelu_tanh(x):
    # TODO(synk): PyTorch nn.GELU() default is the exact erf form; the tanh approximation
    # (max abs diff ~1e-3) is used for guaranteed Mosaic lowering. The pure-JAX reference
    # below uses the same formula so the self-check stays tight.
    return 0.5 * x * (1.0 + jnp.tanh(_SQRT_2_OVER_PI * (x + 0.044715 * (x * x * x))))


def _transformer_block_kernel(
    x_ref, g1_ref, b1_ref, wqkv_ref, bqkv_ref, wproj_ref, bproj_ref,
    g2_ref, b2_ref, w1_ref, bb1_ref, w2_ref, bb2_ref, o_ref,
    *, num_heads, head_dim, eps,
):
    f32, bf16 = jnp.float32, jnp.bfloat16
    Bt, S, D = x_ref.shape
    H, hd = num_heads, head_dim

    # Residual stream / LN / softmax / GELU in f32; MXU operands in bf16.
    x = x_ref[...].astype(f32).reshape(Bt * S, D)            # (Bt*S, D)

    def layer_norm(v, g, b):
        # One-pass moments: var = mean(v*v) - mean(v)^2 (two independent lane reductions).
        mu = jnp.mean(v, axis=-1, keepdims=True)
        ms = jnp.mean(v * v, axis=-1, keepdims=True)
        var = ms - mu * mu
        return (v - mu) * jax.lax.rsqrt(var + eps) * g + b

    # ---- Attention branch ---------------------------------------------------
    xn = layer_norm(x, g1_ref[...], b1_ref[...])
    qkv = (jnp.dot(xn.astype(bf16), wqkv_ref[...], preferred_element_type=f32)
           + bqkv_ref[...])                                   # (Bt*S, 3D) f32

    # Move heads into a leading batch dim: (H*Bt, S, hd), batch index = h*Bt + b.
    # Lane slices + leading-axis concat only (no minor-dim reshapes / transposes).
    def split_heads(col0):
        parts = [qkv[:, col0 + h * hd: col0 + (h + 1) * hd].reshape(Bt, S, hd)
                 for h in range(H)]
        return jnp.concatenate(parts, axis=0) if H > 1 else parts[0]

    scale = hd ** -0.5
    q = (split_heads(0) * scale).astype(bf16)                 # scale on (S, hd), not (S, S)
    k = split_heads(D).astype(bf16)
    v = split_heads(2 * D).astype(bf16)

    # Batched contractions over all (head, batch) pairs at once.
    s = jnp.einsum('bqe,bke->bqk', q, k, preferred_element_type=f32)    # (H*Bt, S, S)
    m = jnp.max(s, axis=-1, keepdims=True)
    p = jnp.exp(s - m)                                        # unnormalized probs (f32)
    l = jnp.sum(p, axis=-1, keepdims=True)
    ctx = jnp.einsum('bqk,bke->bqe', p.astype(bf16), v,
                     preferred_element_type=f32)                        # (H*Bt, S, hd)
    # Deferred softmax normalization: one EUP reciprocal on the small (.., S, 1) tensor.
    ctx = ctx * pl.reciprocal(l, approx=True)
    # attn_drop: eval-mode dropout == identity

    # Head-concat folded into the output projection:
    #   concat_h(ctx_h) @ Wproj == sum_h ctx_h @ Wproj[h]  (Wproj pre-reshaped to (H, hd, D))
    ctx = ctx.reshape(H, Bt * S, hd).astype(bf16)
    proj = jnp.einsum('hme,hed->hmd', ctx, wproj_ref[...],
                      preferred_element_type=f32).sum(axis=0)           # (Bt*S, D)
    attn = proj + bproj_ref[...]
    # proj_drop: eval-mode dropout == identity

    x1 = x + attn                                             # residual 1

    # ---- MLP branch ----------------------------------------------------------
    xn2 = layer_norm(x1, g2_ref[...], b2_ref[...])
    h1 = (jnp.dot(xn2.astype(bf16), w1_ref[...], preferred_element_type=f32)
          + bb1_ref[...])
    h1 = _gelu_tanh(h1)
    h2 = (jnp.dot(h1.astype(bf16), w2_ref[...], preferred_element_type=f32)
          + bb2_ref[...])
    # drop: eval-mode dropout == identity

    o_ref[...] = (x1 + h2).reshape(Bt, S, D).astype(o_ref.dtype)


def _vmem_capacity_bytes(default=64 << 20):
    try:
        return int(pltpu.get_tpu_info().vmem_capacity_bytes)
    except Exception:
        return default


def _estimate_vmem_bytes(bt, S, D, Hf, H, x_itemsize):
    """Conservative per-grid-step VMEM working-set estimate (bytes)."""
    rows = bt * S
    f32, bf16 = 4, 2
    io = 2 * 2 * rows * D * x_itemsize                    # x-in + out tiles, double-buffered
    w = (3 * D * D + D * D + D * Hf + Hf * D) * bf16      # matmul weights (bf16)
    w += (3 * D + D + Hf + D + 4 * D) * f32               # biases + LN params
    w *= 2                                                # pipeline double-buffers constants too
    acts = rows * D * f32 * 8                             # x, xn, x1, xn2, h2, attn, out, slack
    acts += rows * 3 * D * (f32 + bf16)                   # qkv + head-batched q/k/v copies
    acts += rows * Hf * (f32 + bf16)                      # h1 (+ bf16 copy)
    acts += H * rows * D * f32                            # per-head projection partials
    acts += 2 * H * bt * S * S * f32                      # scores + probs
    return io + w + acts


def _pick_block_b(B, S, D, Hf, H, x_itemsize, vmem_budget, max_rows=4096):
    """Largest divisor of B whose working set fits the budget (rows capped at max_rows)."""
    fitting = [bt for bt in range(1, B + 1)
               if B % bt == 0
               and _estimate_vmem_bytes(bt, S, D, Hf, H, x_itemsize) <= vmem_budget]
    if not fitting:
        return 1
    capped = [bt for bt in fitting if bt * S <= max_rows]
    return max(capped) if capped else min(fitting)


def transformer_block(x, g1, b1, wqkv, bqkv, wproj, bproj, g2, b2, w1, bb1, w2, bb2,
                      *, num_heads, eps=1e-5, block_b=None):
    """x: (B, S, D). Weights stored as (in, out); biases / LN params as (1, n)."""
    B, S, D = x.shape
    assert D % num_heads == 0
    hd = D // num_heads
    Hf = w1.shape[1]

    vmem_limit = int(_vmem_capacity_bytes() * 0.8)
    if block_b is None:
        block_b = _pick_block_b(B, S, D, Hf, num_heads,
                                jnp.dtype(x.dtype).itemsize, int(vmem_limit * 0.6))
    assert B % block_b == 0

    f32, bf16 = jnp.float32, jnp.bfloat16
    # bf16 weights for the MXU; Wproj pre-reshaped to (H, hd, D) for the head-concat fold.
    params = (
        g1.astype(f32), b1.astype(f32),
        wqkv.astype(bf16), bqkv.astype(f32),
        wproj.reshape(num_heads, hd, D).astype(bf16), bproj.astype(f32),
        g2.astype(f32), b2.astype(f32),
        w1.astype(bf16), bb1.astype(f32),
        w2.astype(bf16), bb2.astype(f32),
    )
    # Constant index_map => weights are fetched once and stay resident in VMEM.
    param_specs = [pl.BlockSpec(p.shape, lambda i, nd=p.ndim: (0,) * nd) for p in params]

    kernel = functools.partial(_transformer_block_kernel,
                               num_heads=num_heads, head_dim=hd, eps=eps)

    return pl.pallas_call(
        kernel,
        out_shape=jax.ShapeDtypeStruct((B, S, D), x.dtype),
        grid_spec=pltpu.PrefetchScalarGridSpec(
            num_scalar_prefetch=0,
            grid=(B // block_b,),
            in_specs=[pl.BlockSpec((block_b, S, D), lambda i: (i, 0, 0))] + param_specs,
            out_specs=pl.BlockSpec((block_b, S, D), lambda i: (i, 0, 0)),
        ),
        compiler_params=pltpu.CompilerParams(
            dimension_semantics=("parallel",),
            vmem_limit_bytes=vmem_limit,
        ),
    )(x, *params)


def transformer_block_ref(x, g1, b1, wqkv, bqkv, wproj, bproj, g2, b2, w1, bb1, w2, bb2,
                          *, num_heads, eps=1e-5):
    """Pure-JAX f32 reference mirroring the PyTorch forward (eval mode)."""
    B, S, D = x.shape
    hd = D // num_heads

    def ln(v, g, b):
        mu = jnp.mean(v, axis=-1, keepdims=True)
        var = jnp.mean((v - mu) ** 2, axis=-1, keepdims=True)
        return (v - mu) * jax.lax.rsqrt(var + eps) * g + b

    xn = ln(x, g1, b1)
    qkv = xn @ wqkv + bqkv                                       # (B, S, 3D)
    qkv = qkv.reshape(B, S, 3, num_heads, hd).transpose(2, 0, 3, 1, 4)
    q, k, v = qkv[0], qkv[1], qkv[2]                             # (B, H, S, hd)
    attn = (q @ jnp.swapaxes(k, -1, -2)) * (hd ** -0.5)
    attn = jax.nn.softmax(attn, axis=-1)
    y = (attn @ v).transpose(0, 2, 1, 3).reshape(B, S, D)
    y = y @ wproj + bproj
    x = x + y
    xn2 = ln(x, g2, b2)
    h = xn2 @ w1 + bb1
    h = _gelu_tanh(h)
    h = h @ w2 + bb2
    return x + h


if __name__ == "__main__":
    B, S, D = 2, 8, 32
    num_heads = 4
    mlp_ratio = 4.0
    Hf = int(D * mlp_ratio)

    key = jax.random.PRNGKey(0)
    ks = jax.random.split(key, 13)

    def w(k, shape, scale=0.02):
        return jax.random.normal(k, shape, jnp.float32) * scale

    x = jax.random.normal(ks[0], (B, S, D), jnp.float32)
    g1 = 1.0 + w(ks[1], (1, D), 0.1)
    b1 = w(ks[2], (1, D), 0.1)
    wqkv = w(ks[3], (D, 3 * D))
    bqkv = w(ks[4], (1, 3 * D))
    wproj = w(ks[5], (D, D))
    bproj = w(ks[6], (1, D))
    g2 = 1.0 + w(ks[7], (1, D), 0.1)
    b2 = w(ks[8], (1, D), 0.1)
    w1 = w(ks[9], (D, Hf))
    bb1 = w(ks[10], (1, Hf))
    w2 = w(ks[11], (Hf, D))
    bb2 = w(ks[12], (1, D))

    params = (g1, b1, wqkv, bqkv, wproj, bproj, g2, b2, w1, bb1, w2, bb2)

    out = transformer_block(x, *params, num_heads=num_heads)
    out = jax.block_until_ready(out)

    ref = transformer_block_ref(x, *params, num_heads=num_heads)
    assert out.shape == (B, S, D)
    max_diff = float(jnp.max(jnp.abs(out - ref)))
    # bf16 MXU operands + approx reciprocal => looser tolerance than a pure-f32 kernel.
    assert jnp.allclose(out, ref, atol=2e-2, rtol=2e-2), f"max abs diff {max_diff}"

    print("KERNEL_OK")
</pallas_src>

<mosaic_0001>
module attributes {stable_mosaic.version = 11 : i64} {
  func.func @_transformer_block_kernel(%arg0: i32, %arg1: memref<2x8x32xf32, #tpu.memory_space<vmem>>, %arg2: memref<1x32xf32, #tpu.memory_space<vmem>>, %arg3: memref<1x32xf32, #tpu.memory_space<vmem>>, %arg4: memref<32x96xbf16, #tpu.memory_space<vmem>>, %arg5: memref<1x96xf32, #tpu.memory_space<vmem>>, %arg6: memref<4x8x32xbf16, #tpu.memory_space<vmem>>, %arg7: memref<1x32xf32, #tpu.memory_space<vmem>>, %arg8: memref<1x32xf32, #tpu.memory_space<vmem>>, %arg9: memref<1x32xf32, #tpu.memory_space<vmem>>, %arg10: memref<32x128xbf16, #tpu.memory_space<vmem>>, %arg11: memref<1x128xf32, #tpu.memory_space<vmem>>, %arg12: memref<128x32xbf16, #tpu.memory_space<vmem>>, %arg13: memref<1x32xf32, #tpu.memory_space<vmem>>, %arg14: memref<2x8x32xf32, #tpu.memory_space<vmem>>) attributes {dimension_semantics = [#tpu.dimension_semantics<parallel>], iteration_bounds = array<i64: 1>, scalar_prefetch = 0 : i64, scratch_operands = 0 : i64, tpu.core_type = #tpu.core_type<tc>, window_params = [{transform_indices = @transform_0, window_bounds = array<i64: 2, 8, 32>}, {pipeline_mode = #tpu.pipeline_mode<synchronous>, transform_indices = @transform_1, window_bounds = array<i64: 1, 32>}, {pipeline_mode = #tpu.pipeline_mode<synchronous>, transform_indices = @transform_2, window_bounds = array<i64: 1, 32>}, {pipeline_mode = #tpu.pipeline_mode<synchronous>, transform_indices = @transform_3, window_bounds = array<i64: 32, 96>}, {pipeline_mode = #tpu.pipeline_mode<synchronous>, transform_indices = @transform_4, window_bounds = array<i64: 1, 96>}, {pipeline_mode = #tpu.pipeline_mode<synchronous>, transform_indices = @transform_5, window_bounds = array<i64: 4, 8, 32>}, {pipeline_mode = #tpu.pipeline_mode<synchronous>, transform_indices = @transform_6, window_bounds = array<i64: 1, 32>}, {pipeline_mode = #tpu.pipeline_mode<synchronous>, transform_indices = @transform_7, window_bounds = array<i64: 1, 32>}, {pipeline_mode = #tpu.pipeline_mode<synchronous>, transform_indices = @transform_8, window_bounds = array<i64: 1, 32>}, {pipeline_mode = #tpu.pipeline_mode<synchronous>, transform_indices = @transform_9, window_bounds = array<i64: 32, 128>}, {pipeline_mode = #tpu.pipeline_mode<synchronous>, transform_indices = @transform_10, window_bounds = array<i64: 1, 128>}, {pipeline_mode = #tpu.pipeline_mode<synchronous>, transform_indices = @transform_11, window_bounds = array<i64: 128, 32>}, {pipeline_mode = #tpu.pipeline_mode<synchronous>, transform_indices = @transform_12, window_bounds = array<i64: 1, 32>}, {transform_indices = @transform_13, window_bounds = array<i64: 2, 8, 32>}]} {
    %c0 = arith.constant 0 : index
    %c0_0 = arith.constant 0 : index
    %c0_1 = arith.constant 0 : index
    %0 = vector.load %arg1[%c0, %c0_0, %c0_1] : memref<2x8x32xf32, #tpu.memory_space<vmem>>, vector<2x8x32xf32>
    %1 = vector.shape_cast %0 : vector<2x8x32xf32> to vector<16x32xf32>
    %c0_2 = arith.constant 0 : index
    %c0_3 = arith.constant 0 : index
    %2 = vector.load %arg2[%c0_2, %c0_3] : memref<1x32xf32, #tpu.memory_space<vmem>>, vector<1x32xf32>
    %c0_4 = arith.constant 0 : index
    %c0_5 = arith.constant 0 : index
    %3 = vector.load %arg3[%c0_4, %c0_5] : memref<1x32xf32, #tpu.memory_space<vmem>>, vector<1x32xf32>
    %cst = arith.constant dense<0.000000e+00> : vector<16xf32>
    %4 = vector.multi_reduction <add>, %1, %cst [1] : vector<16x32xf32> to vector<16xf32>
    %5 = vector.shape_cast %4 : vector<16xf32> to vector<16x1xf32>
    %cst_6 = arith.constant 3.200000e+01 : f32
    %6 = vector.broadcast %cst_6 : f32 to vector<16x1xf32>
    %7 = arith.divf %5, %6 : vector<16x1xf32>
    %8 = arith.mulf %1, %1 : vector<16x32xf32>
    %cst_7 = arith.constant dense<0.000000e+00> : vector<16xf32>
    %9 = vector.multi_reduction <add>, %8, %cst_7 [1] : vector<16x32xf32> to vector<16xf32>
    %10 = vector.shape_cast %9 : vector<16xf32> to vector<16x1xf32>
    %cst_8 = arith.constant 3.200000e+01 : f32
    %11 = vector.broadcast %cst_8 : f32 to vector<16x1xf32>
    %12 = arith.divf %10, %11 : vector<16x1xf32>
    %13 = arith.mulf %7, %7 : vector<16x1xf32>
    %14 = arith.subf %12, %13 : vector<16x1xf32>
    %15 = vector.broadcast %7 : vector<16x1xf32> to vector<16x32xf32>
    %16 = arith.subf %1, %15 : vector<16x32xf32>
    %cst_9 = arith.constant 9.99999974E-6 : f32
    %17 = vector.broadcast %cst_9 : f32 to vector<16x1xf32>
    %18 = arith.addf %14, %17 : vector<16x1xf32>
    %19 = math.rsqrt %18 : vector<16x1xf32>
    %20 = vector.broadcast %19 : vector<16x1xf32> to vector<16x32xf32>
    %21 = arith.mulf %16, %20 : vector<16x32xf32>
    %22 = vector.broadcast %2 : vector<1x32xf32> to vector<16x32xf32>
    %23 = arith.mulf %21, %22 : vector<16x32xf32>
    %24 = vector.broadcast %3 : vector<1x32xf32> to vector<16x32xf32>
    %25 = arith.addf %23, %24 : vector<16x32xf32>
    %26 = arith.truncf %25 : vector<16x32xf32> to vector<16x32xbf16>
    %c0_10 = arith.constant 0 : index
    %c0_11 = arith.constant 0 : index
    %27 = vector.load %arg4[%c0_10, %c0_11] : memref<32x96xbf16, #tpu.memory_space<vmem>>, vector<32x96xbf16>
    %cst_12 = arith.constant dense<0.000000e+00> : vector<16x96xf32>
    %28 = tpu.matmul %26, %27, %cst_12 {dimension_numbers = #tpu.dot_dimension_numbers<[1], [0], [0], [1], [0, 0, 1, 1], [], []>} : vector<16x32xbf16>, vector<32x96xbf16>, vector<16x96xf32> -> vector<16x96xf32>
    %c0_13 = arith.constant 0 : index
    %c0_14 = arith.constant 0 : index
    %29 = vector.load %arg5[%c0_13, %c0_14] : memref<1x96xf32, #tpu.memory_space<vmem>>, vector<1x96xf32>
    %30 = vector.broadcast %29 : vector<1x96xf32> to vector<16x96xf32>
    %31 = arith.addf %28, %30 : vector<16x96xf32>
    %32 = vector.extract_strided_slice %31 {offsets = [0, 0], sizes = [16, 8], strides = [1, 1]} : vector<16x96xf32> to vector<16x8xf32>
    %33 = vector.shape_cast %32 : vector<16x8xf32> to vector<2x8x8xf32>
    %34 = vector.extract_strided_slice %31 {offsets = [0, 8], sizes = [16, 8], strides = [1, 1]} : vector<16x96xf32> to vector<16x8xf32>
    %35 = vector.shape_cast %34 : vector<16x8xf32> to vector<2x8x8xf32>
    %36 = vector.extract_strided_slice %31 {offsets = [0, 16], sizes = [16, 8], strides = [1, 1]} : vector<16x96xf32> to vector<16x8xf32>
    %37 = vector.shape_cast %36 : vector<16x8xf32> to vector<2x8x8xf32>
    %38 = vector.extract_strided_slice %31 {offsets = [0, 24], sizes = [16, 8], strides = [1, 1]} : vector<16x96xf32> to vector<16x8xf32>
    %39 = vector.shape_cast %38 : vector<16x8xf32> to vector<2x8x8xf32>
    %40 = tpu.concatenate %33, %35, %37, %39 in 0 : vector<2x8x8xf32>, vector<2x8x8xf32>, vector<2x8x8xf32>, vector<2x8x8xf32> -> vector<8x8x8xf32>
    %cst_15 = arith.constant 0.353553385 : f32
    %41 = vector.broadcast %cst_15 : f32 to vector<8x8x8xf32>
    %42 = arith.mulf %40, %41 : vector<8x8x8xf32>
    %43 = arith.truncf %42 : vector<8x8x8xf32> to vector<8x8x8xbf16>
    %44 = vector.extract_strided_slice %31 {offsets = [0, 32], sizes = [16, 8], strides = [1, 1]} : vector<16x96xf32> to vector<16x8xf32>
    %45 = vector.shape_cast %44 : vector<16x8xf32> to vector<2x8x8xf32>
    %46 = vector.extract_strided_slice %31 {offsets = [0, 40], sizes = [16, 8], strides = [1, 1]} : vector<16x96xf32> to vector<16x8xf32>
    %47 = vector.shape_cast %46 : vector<16x8xf32> to vector<2x8x8xf32>
    %48 = vector.extract_strided_slice %31 {offsets = [0, 48], sizes = [16, 8], strides = [1, 1]} : vector<16x96xf32> to vector<16x8xf32>
    %49 = vector.shape_cast %48 : vector<16x8xf32> to vector<2x8x8xf32>
    %50 = vector.extract_strided_slice %31 {offsets = [0, 56], sizes = [16, 8], strides = [1, 1]} : vector<16x96xf32> to vector<16x8xf32>
    %51 = vector.shape_cast %50 : vector<16x8xf32> to vector<2x8x8xf32>
    %52 = tpu.concatenate %45, %47, %49, %51 in 0 : vector<2x8x8xf32>, vector<2x8x8xf32>, vector<2x8x8xf32>, vector<2x8x8xf32> -> vector<8x8x8xf32>
    %53 = arith.truncf %52 : vector<8x8x8xf32> to vector<8x8x8xbf16>
    %54 = vector.extract_strided_slice %31 {offsets = [0, 64], sizes = [16, 8], strides = [1, 1]} : vector<16x96xf32> to vector<16x8xf32>
    %55 = vector.shape_cast %54 : vector<16x8xf32> to vector<2x8x8xf32>
    %56 = vector.extract_strided_slice %31 {offsets = [0, 72], sizes = [16, 8], strides = [1, 1]} : vector<16x96xf32> to vector<16x8xf32>
    %57 = vector.shape_cast %56 : vector<16x8xf32> to vector<2x8x8xf32>
    %58 = vector.extract_strided_slice %31 {offsets = [0, 80], sizes = [16, 8], strides = [1, 1]} : vector<16x96xf32> to vector<16x8xf32>
    %59 = vector.shape_cast %58 : vector<16x8xf32> to vector<2x8x8xf32>
    %60 = vector.extract_strided_slice %31 {offsets = [0, 88], sizes = [16, 8], strides = [1, 1]} : vector<16x96xf32> to vector<16x8xf32>
    %61 = vector.shape_cast %60 : vector<16x8xf32> to vector<2x8x8xf32>
    %62 = tpu.concatenate %55, %57, %59, %61 in 0 : vector<2x8x8xf32>, vector<2x8x8xf32>, vector<2x8x8xf32>, vector<2x8x8xf32> -> vector<8x8x8xf32>
    %63 = arith.truncf %62 : vector<8x8x8xf32> to vector<8x8x8xbf16>
    "tpu.trace_start"() <{level = 10 : i32, message = "bqe,bke->bqk"}> : () -> ()
    %cst_16 = arith.constant dense<0.000000e+00> : vector<8x8x8xf32>
    %64 = tpu.matmul %43, %53, %cst_16 {dimension_numbers = #tpu.dot_dimension_numbers<[2], [2], [1], [1], [0, 0, 0, 1, 1, 1], [0], [0]>} : vector<8x8x8xbf16>, vector<8x8x8xbf16>, vector<8x8x8xf32> -> vector<8x8x8xf32>
    "tpu.trace_stop"() : () -> ()
    %cst_17 = arith.constant dense<0xFF800000> : vector<8x8xf32>
    %65 = vector.multi_reduction <maximumf>, %64, %cst_17 [2] : vector<8x8x8xf32> to vector<8x8xf32>
    %66 = vector.shape_cast %65 : vector<8x8xf32> to vector<8x8x1xf32>
    %67 = vector.broadcast %66 : vector<8x8x1xf32> to vector<8x8x8xf32>
    %68 = arith.subf %64, %67 : vector<8x8x8xf32>
    %69 = math.exp %68 : vector<8x8x8xf32>
    %cst_18 = arith.constant dense<0.000000e+00> : vector<8x8xf32>
    %70 = vector.multi_reduction <add>, %69, %cst_18 [2] : vector<8x8x8xf32> to vector<8x8xf32>
    %71 = vector.shape_cast %70 : vector<8x8xf32> to vector<8x8x1xf32>
    %72 = arith.truncf %69 : vector<8x8x8xf32> to vector<8x8x8xbf16>
    "tpu.trace_start"() <{level = 10 : i32, message = "bqk,bke->bqe"}> : () -> ()
    %cst_19 = arith.constant dense<0.000000e+00> : vector<8x8x8xf32>
    %73 = tpu.matmul %72, %63, %cst_19 {dimension_numbers = #tpu.dot_dimension_numbers<[2], [1], [1], [2], [0, 0, 0, 1, 1, 2], [0], [0]>} : vector<8x8x8xbf16>, vector<8x8x8xbf16>, vector<8x8x8xf32> -> vector<8x8x8xf32>
    "tpu.trace_stop"() : () -> ()
    %74 = tpu.reciprocal %71 {approx = true} : vector<8x8x1xf32> -> vector<8x8x1xf32>
    %75 = vector.broadcast %74 : vector<8x8x1xf32> to vector<8x8x8xf32>
    %76 = arith.mulf %73, %75 : vector<8x8x8xf32>
    %77 = vector.shape_cast %76 : vector<8x8x8xf32> to vector<4x16x8xf32>
    %78 = arith.truncf %77 : vector<4x16x8xf32> to vector<4x16x8xbf16>
    %c0_20 = arith.constant 0 : index
    %c0_21 = arith.constant 0 : index
    %c0_22 = arith.constant 0 : index
    %79 = vector.load %arg6[%c0_20, %c0_21, %c0_22] : memref<4x8x32xbf16, #tpu.memory_space<vmem>>, vector<4x8x32xbf16>
    "tpu.trace_start"() <{level = 10 : i32, message = "hme,hed->hmd"}> : () -> ()
    %cst_23 = arith.constant dense<0.000000e+00> : vector<4x16x32xf32>
    %80 = tpu.matmul %78, %79, %cst_23 {dimension_numbers = #tpu.dot_dimension_numbers<[2], [1], [1], [2], [0, 0, 0, 1, 1, 2], [0], [0]>} : vector<4x16x8xbf16>, vector<4x8x32xbf16>, vector<4x16x32xf32> -> vector<4x16x32xf32>
    "tpu.trace_stop"() : () -> ()
    %cst_24 = arith.constant dense<0.000000e+00> : vector<16x32xf32>
    %81 = vector.multi_reduction <add>, %80, %cst_24 [0] : vector<4x16x32xf32> to vector<16x32xf32>
    %c0_25 = arith.constant 0 : index
    %c0_26 = arith.constant 0 : index
    %82 = vector.load %arg7[%c0_25, %c0_26] : memref<1x32xf32, #tpu.memory_space<vmem>>, vector<1x32xf32>
    %83 = vector.broadcast %82 : vector<1x32xf32> to vector<16x32xf32>
    %84 = arith.addf %81, %83 : vector<16x32xf32>
    %85 = arith.addf %1, %84 : vector<16x32xf32>
    %c0_27 = arith.constant 0 : index
    %c0_28 = arith.constant 0 : index
    %86 = vector.load %arg8[%c0_27, %c0_28] : memref<1x32xf32, #tpu.memory_space<vmem>>, vector<1x32xf32>
    %c0_29 = arith.constant 0 : index
    %c0_30 = arith.constant 0 : index
    %87 = vector.load %arg9[%c0_29, %c0_30] : memref<1x32xf32, #tpu.memory_space<vmem>>, vector<1x32xf32>
    %cst_31 = arith.constant dense<0.000000e+00> : vector<16xf32>
    %88 = vector.multi_reduction <add>, %85, %cst_31 [1] : vector<16x32xf32> to vector<16xf32>
    %89 = vector.shape_cast %88 : vector<16xf32> to vector<16x1xf32>
    %cst_32 = arith.constant 3.200000e+01 : f32
    %90 = vector.broadcast %cst_32 : f32 to vector<16x1xf32>
    %91 = arith.divf %89, %90 : vector<16x1xf32>
    %92 = arith.mulf %85, %85 : vector<16x32xf32>
    %cst_33 = arith.constant dense<0.000000e+00> : vector<16xf32>
    %93 = vector.multi_reduction <add>, %92, %cst_33 [1] : vector<16x32xf32> to vector<16xf32>
    %94 = vector.shape_cast %93 : vector<16xf32> to vector<16x1xf32>
    %cst_34 = arith.constant 3.200000e+01 : f32
    %95 = vector.broadcast %cst_34 : f32 to vector<16x1xf32>
    %96 = arith.divf %94, %95 : vector<16x1xf32>
    %97 = arith.mulf %91, %91 : vector<16x1xf32>
    %98 = arith.subf %96, %97 : vector<16x1xf32>
    %99 = vector.broadcast %91 : vector<16x1xf32> to vector<16x32xf32>
    %100 = arith.subf %85, %99 : vector<16x32xf32>
    %cst_35 = arith.constant 9.99999974E-6 : f32
    %101 = vector.broadcast %cst_35 : f32 to vector<16x1xf32>
    %102 = arith.addf %98, %101 : vector<16x1xf32>
    %103 = math.rsqrt %102 : vector<16x1xf32>
    %104 = vector.broadcast %103 : vector<16x1xf32> to vector<16x32xf32>
    %105 = arith.mulf %100, %104 : vector<16x32xf32>
    %106 = vector.broadcast %86 : vector<1x32xf32> to vector<16x32xf32>
    %107 = arith.mulf %105, %106 : vector<16x32xf32>
    %108 = vector.broadcast %87 : vector<1x32xf32> to vector<16x32xf32>
    %109 = arith.addf %107, %108 : vector<16x32xf32>
    %110 = arith.truncf %109 : vector<16x32xf32> to vector<16x32xbf16>
    %c0_36 = arith.constant 0 : index
    %c0_37 = arith.constant 0 : index
    %111 = vector.load %arg10[%c0_36, %c0_37] : memref<32x128xbf16, #tpu.memory_space<vmem>>, vector<32x128xbf16>
    %cst_38 = arith.constant dense<0.000000e+00> : vector<16x128xf32>
    %112 = tpu.matmul %110, %111, %cst_38 {dimension_numbers = #tpu.dot_dimension_numbers<[1], [0], [0], [1], [0, 0, 1, 1], [], []>} : vector<16x32xbf16>, vector<32x128xbf16>, vector<16x128xf32> -> vector<16x128xf32>
    %c0_39 = arith.constant 0 : index
    %c0_40 = arith.constant 0 : index
    %113 = vector.load %arg11[%c0_39, %c0_40] : memref<1x128xf32, #tpu.memory_space<vmem>>, vector<1x128xf32>
    %114 = vector.broadcast %113 : vector<1x128xf32> to vector<16x128xf32>
    %115 = arith.addf %112, %114 : vector<16x128xf32>
    %cst_41 = arith.constant 5.000000e-01 : f32
    %116 = vector.broadcast %cst_41 : f32 to vector<16x128xf32>
    %117 = arith.mulf %116, %115 : vector<16x128xf32>
    %118 = arith.mulf %115, %115 : vector<16x128xf32>
    %119 = arith.mulf %118, %115 : vector<16x128xf32>
    %cst_42 = arith.constant 4.471500e-02 : f32
    %120 = vector.broadcast %cst_42 : f32 to vector<16x128xf32>
    %121 = arith.mulf %120, %119 : vector<16x128xf32>
    %122 = arith.addf %115, %121 : vector<16x128xf32>
    %cst_43 = arith.constant 0.797884583 : f32
    %123 = vector.broadcast %cst_43 : f32 to vector<16x128xf32>
    %124 = arith.mulf %123, %122 : vector<16x128xf32>
    %125 = math.tanh %124 : vector<16x128xf32>
    %cst_44 = arith.constant 1.000000e+00 : f32
    %126 = vector.broadcast %cst_44 : f32 to vector<16x128xf32>
    %127 = arith.addf %126, %125 : vector<16x128xf32>
    %128 = arith.mulf %117, %127 : vector<16x128xf32>
    %129 = arith.truncf %128 : vector<16x128xf32> to vector<16x128xbf16>
    %c0_45 = arith.constant 0 : index
    %c0_46 = arith.constant 0 : index
    %130 = vector.load %arg12[%c0_45, %c0_46] : memref<128x32xbf16, #tpu.memory_space<vmem>>, vector<128x32xbf16>
    %cst_47 = arith.constant dense<0.000000e+00> : vector<16x32xf32>
    %131 = tpu.matmul %129, %130, %cst_47 {dimension_numbers = #tpu.dot_dimension_numbers<[1], [0], [0], [1], [0, 0, 1, 1], [], []>} : vector<16x128xbf16>, vector<128x32xbf16>, vector<16x32xf32> -> vector<16x32xf32>
    %c0_48 = arith.constant 0 : index
    %c0_49 = arith.constant 0 : index
    %132 = vector.load %arg13[%c0_48, %c0_49] : memref<1x32xf32, #tpu.memory_space<vmem>>, vector<1x32xf32>
    %133 = vector.broadcast %132 : vector<1x32xf32> to vector<16x32xf32>
    %134 = arith.addf %131, %133 : vector<16x32xf32>
    %135 = arith.addf %85, %134 : vector<16x32xf32>
    %136 = vector.shape_cast %135 : vector<16x32xf32> to vector<2x8x32xf32>
    %c0_50 = arith.constant 0 : index
    %c0_51 = arith.constant 0 : index
    %c0_52 = arith.constant 0 : index
    %137 = vector.load %arg14[%c0_50, %c0_51, %c0_52] : memref<2x8x32xf32, #tpu.memory_space<vmem>>, vector<2x8x32xf32>
    tpu.vector_store %arg14[%c0_50, %c0_51, %c0_52], %136 {strides = array<i32>} : memref<2x8x32xf32, #tpu.memory_space<vmem>>, vector<2x8x32xf32>,
    return
  }
  func.func @transform_0(%arg0: i32) -> (i32, i32, i32) {
    %c0_i32 = arith.constant 0 : i32
    %c0_i32_0 = arith.constant 0 : i32
    %c0_i32_1 = arith.constant 0 : i32
    return %arg0, %c0_i32, %c0_i32_0 : i32, i32, i32
  }
  func.func @transform_1(%arg0: i32) -> (i32, i32) {
    %c0_i32 = arith.constant 0 : i32
    %c0_i32_0 = arith.constant 0 : i32
    %c0_i32_1 = arith.constant 0 : i32
    return %c0_i32, %c0_i32_0 : i32, i32
  }
  func.func @transform_2(%arg0: i32) -> (i32, i32) {
    %c0_i32 = arith.constant 0 : i32
    %c0_i32_0 = arith.constant 0 : i32
    %c0_i32_1 = arith.constant 0 : i32
    return %c0_i32, %c0_i32_0 : i32, i32
  }
  func.func @transform_3(%arg0: i32) -> (i32, i32) {
    %c0_i32 = arith.constant 0 : i32
    %c0_i32_0 = arith.constant 0 : i32
    %c0_i32_1 = arith.constant 0 : i32
    return %c0_i32, %c0_i32_0 : i32, i32
  }
  func.func @transform_4(%arg0: i32) -> (i32, i32) {
    %c0_i32 = arith.constant 0 : i32
    %c0_i32_0 = arith.constant 0 : i32
    %c0_i32_1 = arith.constant 0 : i32
    return %c0_i32, %c0_i32_0 : i32, i32
  }
  func.func @transform_5(%arg0: i32) -> (i32, i32, i32) {
    %c0_i32 = arith.constant 0 : i32
    %c0_i32_0 = arith.constant 0 : i32
    %c0_i32_1 = arith.constant 0 : i32
    %c0_i32_2 = arith.constant 0 : i32
    return %c0_i32, %c0_i32_0, %c0_i32_1 : i32, i32, i32
  }
  func.func @transform_6(%arg0: i32) -> (i32, i32) {
    %c0_i32 = arith.constant 0 : i32
    %c0_i32_0 = arith.constant 0 : i32
    %c0_i32_1 = arith.constant 0 : i32
    return %c0_i32, %c0_i32_0 : i32, i32
  }
  func.func @transform_7(%arg0: i32) -> (i32, i32) {
    %c0_i32 = arith.constant 0 : i32
    %c0_i32_0 = arith.constant 0 : i32
    %c0_i32_1 = arith.constant 0 : i32
    return %c0_i32, %c0_i32_0 : i32, i32
  }
  func.func @transform_8(%arg0: i32) -> (i32, i32) {
    %c0_i32 = arith.constant 0 : i32
    %c0_i32_0 = arith.constant 0 : i32
    %c0_i32_1 = arith.constant 0 : i32
    return %c0_i32, %c0_i32_0 : i32, i32
  }
  func.func @transform_9(%arg0: i32) -> (i32, i32) {
    %c0_i32 = arith.constant 0 : i32
    %c0_i32_0 = arith.constant 0 : i32
    %c0_i32_1 = arith.constant 0 : i32
    return %c0_i32, %c0_i32_0 : i32, i32
  }
  func.func @transform_10(%arg0: i32) -> (i32, i32) {
    %c0_i32 = arith.constant 0 : i32
    %c0_i32_0 = arith.constant 0 : i32
    %c0_i32_1 = arith.constant 0 : i32
    return %c0_i32, %c0_i32_0 : i32, i32
  }
  func.func @transform_11(%arg0: i32) -> (i32, i32) {
    %c0_i32 = arith.constant 0 : i32
    %c0_i32_0 = arith.constant 0 : i32
    %c0_i32_1 = arith.constant 0 : i32
    return %c0_i32, %c0_i32_0 : i32, i32
  }
  func.func @transform_12(%arg0: i32) -> (i32, i32) {
    %c0_i32 = arith.constant 0 : i32
    %c0_i32_0 = arith.constant 0 : i32
    %c0_i32_1 = arith.constant 0 : i32
    return %c0_i32, %c0_i32_0 : i32, i32
  }
  func.func @transform_13(%arg0: i32) -> (i32, i32, i32) {
    %c0_i32 = arith.constant 0 : i32
    %c0_i32_0 = arith.constant 0 : i32
    %c0_i32_1 = arith.constant 0 : i32
    return %arg0, %c0_i32, %c0_i32_0 : i32, i32, i32
  }
}

</mosaic_0001>

<bundles_post_ra>
// kernel: tpu_custom_call.1
= control target key start
LH: loop header
LB: loop body
LE: loop exit
PB: predicated region body
PF: predicated region fallthrough
CT: control target
= control target key end

     0   :  { %vm50_vm0 = vcmask 261120   ;;  %s2328_s0 = inlined_call_operand.vmem [shape: f32[2,8,32], index: 0, kind: input, shape index: {}]   ;;  %s2329_s1 = inlined_call_operand.vmem [shape: f32[1,32], index: 1, kind: input, shape index: {}]   ;;  %s2330_s2 = inlined_call_operand.vmem [shape: f32[1,32], index: 2, kind: input, shape index: {}]   ;;  %s2331_s3 = inlined_call_operand.vmem [shape: bf16[32,96], index: 3, kind: input, shape index: {}]   ;;  %s2332_s4 = inlined_call_operand.vmem [shape: f32[1,96], index: 4, kind: input, shape index: {}]   ;;  %s2333_s5 = inlined_call_operand.vmem [shape: bf16[4,8,32], index: 5, kind: input, shape index: {}]   ;;  %s2334_s6 = inlined_call_operand.vmem [shape: f32[1,32], index: 6, kind: input, shape index: {}]   ;;  %s2335_s7 = inlined_call_operand.vmem [shape: f32[1,32], index: 7, kind: input, shape index: {}]   ;;  %s2336_s8 = inlined_call_operand.vmem [shape: f32[1,32], index: 8, kind: input, shape index: {}]   ;;  %s2337_s9 = inlined_call_operand.vmem [shape: bf16[32,128], index: 9, kind: input, shape index: {}]   ;;  %s2338_s10 = inlined_call_operand.vmem [shape: f32[1,128], index: 10, kind: input, shape index: {}]   ;;  %s2339_s11 = inlined_call_operand.vmem [shape: bf16[128,32], index: 11, kind: input, shape index: {}]   ;;  %s2340_s12 = inlined_call_operand.vmem [shape: f32[1,32], index: 12, kind: input, shape index: {}]   ;;  %s2341_s13 = inlined_call_operand.hbm [shape: f32[2,8,32], index: 13, kind: output, shape index: {}]  }
   0x1   :  { %v1998_v0 = vld [vmem:[%s2328_s0] sm:$0xff]  ;;  %v2003_v1 = vld [vmem:[%s2328_s0 + $0x8] sm:$0xff] }
   0x2   :  { %v51_v2 = vsel %vm50_vm0, %v1998_v0, 0.0  ;;  %v60_v3 = vmul.f32 %v1998_v0, %v1998_v0  ;;  %v54_v4 = vsel %vm50_vm0, %v2003_v1, 0.0  ;;  %v61_v5 = vmul.f32 %v2003_v1, %v2003_v1 }
   0x3   :  { %52 = vadd.xlane.f32.xlu0 %v51_v2 }
   0x4   :  { %v62_v6 = vsel %vm50_vm0, %v60_v3, 0.0  ;;  %v65_v7 = vsel %vm50_vm0, %v61_v5, 0.0 }
   0x5   :  { %63 = vadd.xlane.f32.xlu1 %v62_v6 }
   0x7   :  { %55 = vadd.xlane.f32.xlu0 %v54_v4 }
   0x9   :  { %66 = vadd.xlane.f32.xlu1 %v65_v7 }
   0xa   :  { %18 = vsyncpa [#allocation3], 0  ;;  %v1835_v8 = vld [vmem:[%s2331_s3] sm:$0xff]   ;;  %v1915_v9 = vmov 0.0   ;;  %vm1916_vm1 = vmmov 0   ;;  %v1836_v10 = vld [vmem:[%s2331_s3 + $0x8] sm:$0xff]  }
   0xb   :  { %1669 = vmatprep.subr.bf16.mxu1 %v1915_v9  ;;  %1673 = vmatprep.mubr.msk.bf16.mxu1 %vm1916_vm1, %v1915_v9  ;;  %v1572_v28 = vld [vmem:[%s2329_s1] ss:$0 sm:$0xff]  ;;  %s1917_s19 = smov 120   ;;  %s1919_s20 = smov 112   ;;  %vm213_vm2 = vcmask 64512   ;;  %vm688_vm3 = vcmask 1043456  }
   0xc   :  { %1670 = vmatpush3.bf16.msra.mxu1 %v1835_v8  ;;  %1695 = vmatprep.subr.bf16.mxu0 %v1915_v9  ;;  %v1573_v33 = vld [vmem:[%s2330_s2] ss:$0 sm:$0xff]  ;;  %s1918_s2 = smov 104   ;;  %s1920_s21 = smov 96  }
   0xd   :  { %1671 = vmatprep.subr.bf16.mxu1 %v1915_v9  ;;  %1697 = vmatprep.mubr.msk.bf16.mxu0 %vm1916_vm1, %v1915_v9  ;;  %v1574_v38 = vld [vmem:[%s2332_s4] ss:$0 sm:$0xff]  ;;  %s1921_s4 = smov 64   ;;  %s1922_s29 = smov [#allocation2]  }
  0x10   :  { %1672 = vmatpush3.bf16.msra.mxu1 %v1836_v10 }
  0x11   :  { %1677 = vmatprep.subr.bf16.mxu1 %v1915_v9 }
  0x90   :  { %v53_v11 = vpop.xlane.xlu0 %52 }
  0x91   :  { %v58_v12 = vmul.f32 0.03125, %v53_v11 }
  0x92   :  { %v64_v13 = vpop.xlane.xlu1 %63 }
  0x93   :  { %v70_v14 = vmul.f32 %v58_v12, %v58_v12  ;;  %v68_v15 = vmul.f32 0.03125, %v64_v13  ;;  %v74_v25 = vsub.f32 %v1998_v0, %v58_v12 }
  0x94   :  { %v56_v16 = vpop.xlane.xlu0 %55 }
  0x95   :  { %v72_v17 = vsub.f32 %v68_v15, %v70_v14  ;;  %v59_v18 = vmul.f32 0.03125, %v56_v16 }
  0x96   :  { %v67_v19 = vpop.xlane.xlu1 %66 }
  0x97   :  { %v76_v20 = vadd.f32 1e-05, %v72_v17  ;;  %v71_v21 = vmul.f32 %v59_v18, %v59_v18  ;;  %v69_v22 = vmul.f32 0.03125, %v67_v19  ;;  %v75_v29 = vsub.f32 %v2003_v1, %v59_v18 }
  0x99   :  { %1847 = vrsqrt.f32 %v76_v20  ;;  %v73_v23 = vsub.f32 %v69_v22, %v71_v21 }
  0x9b   :  { %v77_v24 = vadd.f32 1e-05, %v73_v23 }
  0x9d   :  { %1849 = vrsqrt.f32 %v77_v24 }
  0xa3   :  { %v1848_v26 = vpop.eup %1847 }
  0xa4   :  { %v80_v27 = vmul.f32 %v1848_v26, %v74_v25 }
  0xa6   :  { %v88_v32 = vmul.f32 %v1572_v28, %v80_v27 }
  0xa7   :  { %v1850_v30 = vpop.eup %1849 }
  0xa8   :  { %v81_v31 = vmul.f32 %v1850_v30, %v75_v29  ;;  %v96_v35 = vadd.f32 %v1573_v33, %v88_v32 }
  0xaa   :  { %v89_v34 = vmul.f32 %v1572_v28, %v81_v31 }
  0xac   :  { %v97_v36 = vadd.f32 %v1573_v33, %v89_v34 }
  0xae   :  { %v98_v37 = vpack.c.bf16 %v97_v36, %v96_v35 }
  0xb0   :  { %1674 = vmatmul.mubr.msk.bf16.vlgmr.msra.gmra.mrb[0].mxu1 %vm50_vm0, %v98_v37 }
  0xb1   :  { %1679 = vmatprep.mubr.msk.bf16.mxu1 %vm1916_vm1, %v1915_v9 }
 0x183   :  { %v159_v39 = vpop.f32.mrb[0].mxu1 }
 0x184   :  { %v160_v40 = vadd.f32 %v1574_v38, %v159_v39  ;;  %v1675_v41 = vpop.f32.mrb[1].mxu1 }
 0x185   :  { %v162_v42 = vpop.f32.mrb[2].mxu1 }
 0x186   :  { %v163_v43 = vadd.f32 %v1574_v38, %v162_v42  ;;  %168 = vrot.lane.b32.xlu0 %v160_v40, %s1917_s19  ;;  %v1676_v44 = vpop.f32.mrb[3].mxu1  ;;  %v202_v45 = vpack.c.bf16 %v160_v40, %v160_v40  ;;  %v186_v59 = vmul.f32 0.35355338, %v160_v40 }
 0x188   :  { %170 = vrot.lane.b32.xlu1 %v163_v43, %s1917_s19  ;;  %v203_v46 = vpack.c.bf16 %v163_v43, %v163_v43  ;;  %v194_v62 = vpack.c.bf16 %v186_v59, %v186_v59  ;;  %v187_v3 = vmul.f32 0.35355338, %v163_v43 }
 0x18a   :  { %180 = vrot.lane.b32.xlu0 %v160_v40, %s1918_s2  ;;  %v195_v4 = vpack.c.bf16 %v187_v3, %v187_v3 }
 0x18c   :  { %174 = vrot.lane.b32.xlu1 %v160_v40, %s1919_s20 }
 0x18e   :  { %211 = vrot.lane.b32.xlu0 %v202_v45, %s1920_s21 }
 0x190   :  { %176 = vrot.lane.b32.xlu1 %v163_v43, %s1919_s20 }
 0x194   :  { %182 = vrot.lane.b32.xlu1 %v163_v43, %s1918_s2 }
 0x198   :  { %261 = vrot.lane.b32.xlu1 %v203_v46, %s1920_s21 }
 0x1f8   :  { %v169_v47 = vpop.permute.xlu0 %168 }
 0x1f9   :  { %v204_v48 = vpack.c.bf16 %v169_v47, %v169_v47  ;;  %v188_v8 = vmul.f32 0.35355338, %v169_v47 }
 0x1fa   :  { %v171_v49 = vpop.permute.xlu1 %170 }
 0x1fb   :  { %v205_v50 = vpack.c.bf16 %v171_v49, %v171_v49  ;;  %310 = vrot.lane.b32.xlu0 %v204_v48, %s1920_s21  ;;  %v189_v11 = vmul.f32 0.35355338, %v171_v49  ;;  %v196_v13 = vpack.c.bf16 %v188_v8, %v188_v8 }
 0x1fc   :  { %v2046_v51 = vpop.permute.xlu0 %180 }
 0x1fd   :  { %359 = vrot.lane.b32.xlu1 %v205_v50, %s1920_s21  ;;  %v2056_v57 = vpack.c.bf16 %v2046_v51, %v2046_v51  ;;  %v197_v14 = vpack.c.bf16 %v189_v11, %v189_v11  ;;  %v192_v25 = vmul.f32 0.35355338, %v2046_v51 }
 0x1fe   :  { %v175_v52 = vpop.permute.xlu1 %174 }
 0x1ff   :  { %v2049_v53 = vpack.c.bf16 %v175_v52, %v175_v52  ;;  %v190_v17 = vmul.f32 0.35355338, %v175_v52  ;;  %v200_v29 = vpack.c.bf16 %v192_v25, %v192_v25 }
 0x200   :  { %v212_v54 = vpop.permute.xlu0 %211 }
 0x201   :  { %v218_v55 = vsel %vm213_vm2, %v212_v54, 0  ;;  %408 = vrot.lane.b32.xlu0 %v2049_v53, %s1920_s21  ;;  %v198_v21 = vpack.c.bf16 %v190_v17, %v190_v17 }
 0x202   :  { %1678 = vmatpush3.bf16.xpose.msra.mxu1 %v218_v55  ;;  %v177_v56 = vpop.permute.xlu1 %176 }
 0x203   :  { %v2058_v58 = vpack.c.bf16 %v177_v56, %v177_v56  ;;  %1683 = vmatprep.subr.bf16.mxu1 %v1915_v9  ;;  %v191_v19 = vmul.f32 0.35355338, %v177_v56 }
 0x205   :  { %506 = vrot.lane.b32.xlu0 %v2056_v57, %s1920_s21  ;;  %457 = vrot.lane.b32.xlu1 %v2058_v58, %s1920_s21  ;;  %v199_v23 = vpack.c.bf16 %v191_v19, %v191_v19 }
 0x206   :  { %v183_v60 = vpop.permute.xlu1 %182 }
 0x207   :  { %v2065_v61 = vpack.c.bf16 %v183_v60, %v183_v60  ;;  %v193_v27 = vmul.f32 0.35355338, %v183_v60 }
 0x209   :  { %1680 = vmatmul.mubr.msk.bf16.vlgmr.msra.gmra.mrb[4].mxu1 %vm213_vm2, %v194_v62  ;;  %683 = vrot.lane.b32.xlu0 %v202_v45, %s1921_s4  ;;  %v201_v31 = vpack.c.bf16 %v193_v27, %v193_v27 }
 0x20a   :  { %555 = vrot.lane.b32.xlu1 %v2065_v61, %s1920_s21  ;;  %v262_v63 = vpop.permute.xlu1 %261  ;;  %1685 = vmatprep.mubr.msk.bf16.mxu1 %vm1916_vm1, %v1915_v9 }
 0x20b   :  { %v267_v2 = vsel %vm213_vm2, %v262_v63, 0 }
 0x20c   :  { %1684 = vmatpush3.bf16.xpose.msra.mxu1 %v267_v2 }
 0x20d   :  { %1689 = vmatprep.subr.bf16.mxu1 %v1915_v9 }
 0x20e   :  { %732 = vrot.lane.b32.xlu1 %v203_v46, %s1921_s4 }
 0x212   :  { %780 = vrot.lane.b32.xlu1 %v204_v48, %s1921_s4 }
 0x213   :  { %1686 = vmatmul.mubr.msk.bf16.vlgmr.msra.gmra.mrb[8].mxu1 %vm213_vm2, %v195_v4 }
 0x214   :  { %1691 = vmatprep.mubr.msk.bf16.mxu1 %vm1916_vm1, %v1915_v9 }
 0x216   :  { %828 = vrot.lane.b32.xlu1 %v205_v50, %s1921_s4 }
 0x26d   :  { %v311_v5 = vpop.permute.xlu0 %310 }
 0x26e   :  { %v316_v6 = vsel %vm213_vm2, %v311_v5, 0 }
 0x26f   :  { %v360_v7 = vpop.permute.xlu1 %359  ;;  %1690 = vmatpush3.bf16.xpose.msra.mxu1 %v316_v6 }
 0x270   :  { %v365_v10 = vsel %vm213_vm2, %v360_v7, 0  ;;  %1701 = vmatprep.subr.bf16.mxu1 %v1915_v9 }
 0x271   :  { %1696 = vmatpush3.bf16.xpose.msra.mxu0 %v365_v10 }
 0x272   :  { %1707 = vmatprep.subr.bf16.mxu0 %v1915_v9 }
 0x273   :  { %v409_v12 = vpop.permute.xlu0 %408 }
 0x274   :  { %v414_v15 = vsel %vm213_vm2, %v409_v12, 0 }
 0x276   :  { %1692 = vmatmul.mubr.msk.bf16.vlgmr.msra.gmra.mrb[12].mxu1 %vm213_vm2, %v196_v13 }
 0x277   :  { %v458_v16 = vpop.permute.xlu1 %457  ;;  %1702 = vmatpush3.bf16.xpose.msra.mxu1 %v414_v15  ;;  %1703 = vmatprep.mubr.msk.bf16.mxu1 %vm1916_vm1, %v1915_v9  ;;  %v507_v20 = vpop.permute.xlu0 %506 }
 0x278   :  { %v463_v18 = vsel %vm213_vm2, %v458_v16, 0  ;;  %1698 = vmatmul.mubr.msk.bf16.vlgmr.msra.gmra.mrb[0].mxu0 %vm213_vm2, %v197_v14  ;;  %1713 = vmatprep.subr.bf16.mxu1 %v1915_v9  ;;  %v512_v24 = vsel %vm213_vm2, %v507_v20, 0 }
 0x279   :  { %1708 = vmatpush3.bf16.xpose.msra.mxu0 %v463_v18  ;;  %1709 = vmatprep.mubr.msk.bf16.mxu0 %vm1916_vm1, %v1915_v9 }
 0x27a   :  { %1719 = vmatprep.subr.bf16.mxu0 %v1915_v9 }
 0x27b   :  { %v684_v28 = vpop.permute.xlu0 %683 }
 0x27c   :  { %v556_v22 = vpop.permute.xlu1 %555  ;;  %v690_v32 = vsel %vm688_vm3, %v684_v28, 0 }
 0x27d   :  { %v561_v26 = vsel %vm213_vm2, %v556_v22, 0 }
 0x27e   :  { %1704 = vmatmul.mubr.msk.bf16.vlgmr.msra.gmra.mrb[16].mxu1 %vm213_vm2, %v198_v21 }
 0x27f   :  { %1714 = vmatpush3.bf16.xpose.msra.mxu1 %v512_v24  ;;  %1715 = vmatprep.mubr.msk.bf16.mxu1 %vm1916_vm1, %v1915_v9 }
 0x280   :  { %1710 = vmatmul.mubr.msk.bf16.vlgmr.msra.gmra.mrb[4].mxu0 %vm213_vm2, %v199_v23  ;;  %1725 = vmatprep.subr.bf16.mxu1 %v1915_v9  ;;  %v733_v30 = vpop.permute.xlu1 %732 }
 0x281   :  { %1720 = vmatpush3.bf16.xpose.msra.mxu0 %v561_v26  ;;  %1721 = vmatprep.mubr.msk.bf16.mxu0 %vm1916_vm1, %v1915_v9  ;;  %v738_v33 = vsel %vm688_vm3, %v733_v30, 0 }
 0x282   :  { %1731 = vmatprep.subr.bf16.mxu0 %v1915_v9 }
 0x284   :  { %v781_v14 = vpop.permute.xlu1 %780 }
 0x285   :  { %v786_v24 = vsel %vm688_vm3, %v781_v14, 0 }
 0x286   :  { %1716 = vmatmul.mubr.msk.bf16.vlgmr.msra.gmra.mrb[20].mxu1 %vm213_vm2, %v200_v29 }
 0x287   :  { %1726 = vmatpush3.bf16.msra.mxu1 %v690_v32  ;;  %1727 = vmatprep.mubr.msk.bf16.mxu1 %vm1916_vm1, %v1915_v9 }
 0x288   :  { %1722 = vmatmul.mubr.msk.bf16.vlgmr.msra.gmra.mrb[8].mxu0 %vm213_vm2, %v201_v31  ;;  %1737 = vmatprep.subr.bf16.mxu1 %v1915_v9  ;;  %v829_v18 = vpop.permute.xlu1 %828 }
 0x289   :  { %1732 = vmatpush3.bf16.msra.mxu0 %v738_v33  ;;  %1733 = vmatprep.mubr.msk.bf16.mxu0 %vm1916_vm1, %v1915_v9  ;;  %v834_v26 = vsel %vm688_vm3, %v829_v18, 0 }
 0x28a   :  { %1743 = vmatprep.subr.bf16.mxu0 %v1915_v9 }
 0x2dc   :  { %v254_v34 = vpop.f32.mrb[4].mxu1 }
 0x2dd   :  { %v1681_v35 = vpop.f32.mrb[5].mxu1  ;;  %v603_v36 = vsel %vm213_vm2, %v254_v34, -inf }
 0x2de   :  { %604 = vmax.xlane.f32.xlu0 %v603_v36  ;;  %v257_v37 = vpop.f32.mrb[6].mxu1 }
 0x2df   :  { %v1682_v38 = vpop.f32.mrb[7].mxu1 }
 0x2e6   :  { %v303_v39 = vpop.f32.mrb[8].mxu1 }
 0x2e7   :  { %v1687_v40 = vpop.f32.mrb[9].mxu1  ;;  %v606_v41 = vsel %vm213_vm2, %v303_v39, -inf }
 0x2e8   :  { %607 = vmax.xlane.f32.xlu1 %v606_v41  ;;  %v306_v42 = vpop.f32.mrb[10].mxu1 }
 0x2e9   :  { %v1688_v43 = vpop.f32.mrb[11].mxu1 }
 0x2f9   :  { %924 = vrot.lane.b32.xlu1 %v2058_v58, %s1921_s4 }
 0x349   :  { %v2120_v44 = vpop.f32.mrb[12].mxu1 }
 0x34a   :  { %v1693_v45 = vpop.f32.mrb[13].mxu1  ;;  %v609_v46 = vsel %vm213_vm2, %v2120_v44, -inf }
 0x34b   :  { %v2124_v47 = vpop.f32.mrb[0].mxu0  ;;  %610 = vmax.xlane.f32.xlu0 %v609_v46  ;;  %v355_v48 = vpop.f32.mrb[14].mxu1 }
 0x34c   :  { %v1694_v49 = vpop.f32.mrb[15].mxu1  ;;  %v1699_v50 = vpop.f32.mrb[1].mxu0  ;;  %v612_v54 = vsel %vm213_vm2, %v2124_v47, -inf }
 0x34d   :  { %v404_v51 = vpop.f32.mrb[2].mxu0 }
 0x34e   :  { %v1700_v52 = vpop.f32.mrb[3].mxu0 }
 0x34f   :  { %613 = vmax.xlane.f32.xlu0 %v612_v54 }
 0x351   :  { %v2128_v55 = vpop.f32.mrb[16].mxu1 }
 0x352   :  { %v1705_v56 = vpop.f32.mrb[17].mxu1 }
 0x353   :  { %v453_v58 = vpop.f32.mrb[18].mxu1  ;;  %v2130_v59 = vpop.f32.mrb[4].mxu0 }
 0x354   :  { %v1706_v60 = vpop.f32.mrb[19].mxu1  ;;  %v1711_v62 = vpop.f32.mrb[5].mxu0  ;;  %v618_v63 = vsel %vm213_vm2, %v2130_v59, -inf }
 0x355   :  { %v502_v2 = vpop.f32.mrb[6].mxu0  ;;  %619 = vmax.xlane.f32.xlu1 %v618_v63 }
 0x356   :  { %v1712_v3 = vpop.f32.mrb[7].mxu0 }
 0x359   :  { %v2134_v4 = vpop.f32.mrb[20].mxu1 }
 0x35a   :  { %v1717_v5 = vpop.f32.mrb[21].mxu1  ;;  %v621_v27 = vsel %vm213_vm2, %v2134_v4, -inf }
 0x35b   :  { %v551_v6 = vpop.f32.mrb[22].mxu1  ;;  %v2136_v7 = vpop.f32.mrb[8].mxu0 }
 0x35c   :  { %v1718_v8 = vpop.f32.mrb[23].mxu1  ;;  %v1723_v10 = vpop.f32.mrb[9].mxu0  ;;  %v624_v11 = vsel %vm213_vm2, %v2136_v7, -inf }
 0x35d   :  { %v600_v12 = vpop.f32.mrb[10].mxu0  ;;  %625 = vmax.xlane.f32.xlu1 %v624_v11 }
 0x35e   :  { %v1724_v13 = vpop.f32.mrb[11].mxu0 }
 0x365   :  { %876 = vrot.lane.b32.xlu0 %v2049_v53, %s1921_s4  ;;  %v615_v53 = vsel %vm213_vm2, %v2128_v55, -inf }
 0x36b   :  { %v605_v15 = vpop.xlane.xlu0 %604 }
 0x36c   :  { %v627_v16 = vsub.f32 %v254_v34, %v605_v15 }
 0x36e   :  { %v635_v17 = vmul.f32 1.442695, %v627_v16  ;;  %1020 = vrot.lane.b32.xlu1 %v2065_v61, %s1921_s4 }
 0x370   :  { %1851 = vpow2.f32 %v635_v17  ;;  %v1089_v17 = vld [vmem:[%s2333_s5 + $0x4] sm:$0xf] }
 0x371   :  { %v1143_v18 = vsel %vm688_vm3, %v1089_v17, 0 }
 0x375   :  { %v608_v19 = vpop.xlane.xlu1 %607 }
 0x376   :  { %v628_v20 = vsub.f32 %v303_v39, %v608_v19 }
 0x378   :  { %v637_v21 = vmul.f32 1.442695, %v628_v20 }
 0x379   :  { %v925_v35 = vpop.permute.xlu1 %924 }
 0x37a   :  { %v1852_v22 = vpop.eup %1851  ;;  %1853 = vpow2.f32 %v637_v21  ;;  %v930_v50 = vsel %vm688_vm3, %v925_v35, 0 }
 0x37b   :  { %v675_v23 = vpack.c.bf16 %v1852_v22, %v1852_v22  ;;  %v651_v29 = vsel %vm213_vm2, %v1852_v22, 0.0 }
 0x37d   :  { %1728 = vmatmul.mubr.msk.bf16.vlgmr.msra.gmra.mrb[24].mxu1 %vm213_vm2, %v675_v23 }
 0x37e   :  { %1738 = vmatpush3.bf16.msra.mxu1 %v786_v24  ;;  %1739 = vmatprep.mubr.msk.bf16.mxu1 %vm1916_vm1, %v1915_v9 }
 0x37f   :  { %1749 = vmatprep.subr.bf16.mxu1 %v1915_v9 }
 0x384   :  { %v1854_v61 = vpop.eup %1853  ;;  %616 = vmax.xlane.f32.xlu0 %v615_v53 }
 0x385   :  { %v676_v25 = vpack.c.bf16 %v1854_v61, %v1854_v61  ;;  %v654_v28 = vsel %vm213_vm2, %v1854_v61, 0.0 }
 0x387   :  { %1734 = vmatmul.mubr.msk.bf16.vlgmr.msra.gmra.mrb[12].mxu0 %vm213_vm2, %v676_v25 }
 0x388   :  { %1744 = vmatpush3.bf16.msra.mxu0 %v834_v26  ;;  %622 = vmax.xlane.f32.xlu0 %v621_v27 }
 0x389   :  { %1745 = vmatprep.mubr.msk.bf16.mxu0 %vm1916_vm1, %v1915_v9  ;;  %1755 = vmatprep.subr.bf16.mxu0 %v1915_v9 }
 0x392   :  { %655 = vadd.xlane.f32.xlu1 %v654_v28 }
 0x39e   :  { %972 = vrot.lane.b32.xlu0 %v2056_v57, %s1921_s4 }
 0x3bd   :  { %652 = vadd.xlane.f32.xlu0 %v651_v29 }
 0x3d8   :  { %v611_v30 = vpop.xlane.xlu0 %610 }
 0x3d9   :  { %v629_v31 = vsub.f32 %v2120_v44, %v611_v30 }
 0x3db   :  { %v639_v32 = vmul.f32 1.442695, %v629_v31 }
 0x3dc   :  { %v614_v33 = vpop.xlane.xlu0 %613 }
 0x3dd   :  { %1855 = vpow2.f32 %v639_v32  ;;  %v630_v34 = vsub.f32 %v2124_v47, %v614_v33  ;;  %v1090_v32 = vld [vmem:[%s2333_s5 + $0x8] sm:$0xf] }
 0x3de   :  { %v1190_v33 = vsel %vm688_vm3, %v1090_v32, 0 }
 0x3df   :  { %v641_v36 = vmul.f32 1.442695, %v630_v34 }
 0x3e0   :  { %v877_v57 = vpop.permute.xlu0 %876 }
 0x3e1   :  { %1857 = vpow2.f32 %v641_v36  ;;  %v882_v43 = vsel %vm688_vm3, %v877_v57, 0 }
 0x3e2   :  { %v620_v37 = vpop.xlane.xlu1 %619 }
 0x3e3   :  { %v632_v38 = vsub.f32 %v2130_v59, %v620_v37 }
 0x3e5   :  { %v645_v39 = vmul.f32 1.442695, %v632_v38 }
 0x3e7   :  { %v1856_v40 = vpop.eup %1855  ;;  %1859 = vpow2.f32 %v645_v39 }
 0x3e8   :  { %v657_v41 = vsel %vm213_vm2, %v1856_v40, 0.0  ;;  %v677_v42 = vpack.c.bf16 %v1856_v40, %v1856_v40 }
 0x3e9   :  { %658 = vadd.xlane.f32.xlu0 %v657_v41 }
 0x3ea   :  { %v626_v44 = vpop.xlane.xlu1 %625  ;;  %1740 = vmatmul.mubr.msk.bf16.vlgmr.msra.gmra.mrb[28].mxu1 %vm213_vm2, %v677_v42  ;;  %v1091_v42 = vld [vmem:[%s2333_s5 + $0xc] sm:$0xf] }
 0x3eb   :  { %v1858_v45 = vpop.eup %1857  ;;  %v634_v46 = vsub.f32 %v2136_v7, %v626_v44  ;;  %1750 = vmatpush3.bf16.msra.mxu1 %v882_v43  ;;  %1751 = vmatprep.mubr.msk.bf16.mxu1 %vm1916_vm1, %v1915_v9 }
 0x3ec   :  { %v660_v47 = vsel %vm213_vm2, %v1858_v45, 0.0  ;;  %v678_v48 = vpack.c.bf16 %v1858_v45, %v1858_v45  ;;  %1761 = vmatprep.subr.bf16.mxu1 %v1915_v9 }
 0x3ed   :  { %v649_v49 = vmul.f32 1.442695, %v634_v46  ;;  %661 = vadd.xlane.f32.xlu0 %v660_v47 }
 0x3ee   :  { %1746 = vmatmul.mubr.msk.bf16.vlgmr.msra.gmra.mrb[16].mxu0 %vm213_vm2, %v678_v48  ;;  %v1021_v54 = vpop.permute.xlu1 %1020 }
 0x3ef   :  { %1861 = vpow2.f32 %v649_v49  ;;  %1756 = vmatpush3.bf16.msra.mxu0 %v930_v50  ;;  %1757 = vmatprep.mubr.msk.bf16.mxu0 %vm1916_vm1, %v1915_v9  ;;  %v1026_v58 = vsel %vm688_vm3, %v1021_v54, 0  ;;  %v1237_v49 = vsel %vm688_vm3, %v1091_v42, 0 }
 0x3f0   :  { %1767 = vmatprep.subr.bf16.mxu0 %v1915_v9 }
 0x3f1   :  { %v1860_v51 = vpop.eup %1859 }
 0x3f2   :  { %v666_v52 = vsel %vm213_vm2, %v1860_v51, 0.0  ;;  %v680_v56 = vpack.c.bf16 %v1860_v51, %v1860_v51 }
 0x3f3   :  { %667 = vadd.xlane.f32.xlu1 %v666_v52 }
 0x3f6   :  { %1758 = vmatmul.mubr.msk.bf16.vlgmr.msra.gmra.mrb[20].mxu0 %vm213_vm2, %v680_v56 }
 0x3f7   :  { %1768 = vmatpush3.bf16.msra.mxu0 %v1026_v58  ;;  %1769 = vmatprep.mubr.msk.bf16.mxu0 %vm1916_vm1, %v1915_v9 }
 0x3f8   :  { %1779 = vmatprep.subr.bf16.mxu0 %v1915_v9 }
 0x3f9   :  { %v1862_v59 = vpop.eup %1861 }
 0x3fa   :  { %v672_v60 = vsel %vm213_vm2, %v1862_v59, 0.0  ;;  %v682_v62 = vpack.c.bf16 %v1862_v59, %v1862_v59 }
 0x3fb   :  { %673 = vadd.xlane.f32.xlu1 %v672_v60 }
 0x3fe   :  { %1770 = vmatmul.mubr.msk.bf16.vlgmr.msra.gmra.mrb[24].mxu0 %vm213_vm2, %v682_v62 }
 0x3ff   :  { %1781 = vmatprep.mubr.msk.bf16.mxu0 %vm1916_vm1, %v1915_v9  ;;  %1780 = vmatpush3.bf16.msra.mxu0 %v1143_v18 }
 0x400   :  { %1791 = vmatprep.subr.bf16.mxu0 %v1915_v9 }
 0x411   :  { %v617_v63 = vpop.xlane.xlu0 %616 }
 0x412   :  { %v631_v2 = vsub.f32 %v2128_v55, %v617_v63 }
 0x414   :  { %v643_v3 = vmul.f32 1.442695, %v631_v2 }
 0x415   :  { %v623_v5 = vpop.xlane.xlu0 %622 }
 0x416   :  { %1863 = vpow2.f32 %v643_v3  ;;  %v633_v6 = vsub.f32 %v2134_v4, %v623_v5  ;;  %v1088_v4 = vld [vmem:[%s2333_s5] sm:$0xf] }
 0x417   :  { %v1096_v16 = vsel %vm688_vm3, %v1088_v4, 0 }
 0x418   :  { %v647_v7 = vmul.f32 1.442695, %v633_v6 }
 0x419   :  { %v973_v10 = vpop.permute.xlu0 %972 }
 0x41a   :  { %1865 = vpow2.f32 %v647_v7  ;;  %v978_v13 = vsel %vm688_vm3, %v973_v10, 0 }
 0x41f   :  { %v656_v20 = vpop.xlane.xlu1 %655 }
 0x420   :  { %v1864_v8 = vpop.eup %1863 }
 0x421   :  { %v663_v11 = vsel %vm213_vm2, %v1864_v8, 0.0  ;;  %v679_v12 = vpack.c.bf16 %v1864_v8, %v1864_v8 }
 0x422   :  { %664 = vadd.xlane.f32.xlu0 %v663_v11 }
 0x423   :  { %1752 = vmatmul.mubr.msk.bf16.vlgmr.msra.gmra.mrb[32].mxu1 %vm213_vm2, %v679_v12 }
 0x424   :  { %v1866_v14 = vpop.eup %1865  ;;  %1762 = vmatpush3.bf16.msra.mxu1 %v978_v13  ;;  %1763 = vmatprep.mubr.msk.bf16.mxu1 %vm1916_vm1, %v1915_v9 }
 0x425   :  { %v669_v55 = vsel %vm213_vm2, %v1866_v14, 0.0  ;;  %1773 = vmatprep.subr.bf16.mxu1 %v1915_v9  ;;  %v681_v15 = vpack.c.bf16 %v1866_v14, %v1866_v14 }
 0x426   :  { %670 = vadd.xlane.f32.xlu0 %v669_v55 }
 0x42b   :  { %1764 = vmatmul.mubr.msk.bf16.vlgmr.msra.gmra.mrb[36].mxu1 %vm213_vm2, %v681_v15 }
 0x42c   :  { %1774 = vmatpush3.bf16.msra.mxu1 %v1096_v16  ;;  %1775 = vmatprep.mubr.msk.bf16.mxu1 %vm1916_vm1, %v1915_v9 }
 0x42d   :  { %1785 = vmatprep.subr.bf16.mxu1 %v1915_v9 }
 0x44a   :  { %v653_v19 = vpop.xlane.xlu0 %652 }
 0x44b   :  { %1867 = vrcp.f32 %v653_v19 }
 0x44c   :  { %1869 = vrcp.f32 %v656_v20 }
 0x450   :  { %v726_v21 = vpop.f32.mrb[24].mxu1 }
 0x451   :  { %v1729_v22 = vpop.f32.mrb[25].mxu1 }
 0x452   :  { %v729_v23 = vpop.f32.mrb[26].mxu1 }
 0x453   :  { %v1730_v24 = vpop.f32.mrb[27].mxu1 }
 0x455   :  { %v1868_v53 = vpop.eup %1867 }
 0x456   :  { %v1870_v61 = vpop.eup %1869  ;;  %v1076_v26 = vmul.f32 %v1868_v53, %v726_v21 }
 0x45a   :  { %v774_v25 = vpop.f32.mrb[12].mxu0 }
 0x45b   :  { %v1077_v27 = vmul.f32 %v1870_v61, %v774_v25  ;;  %v1735_v28 = vpop.f32.mrb[13].mxu0 }
 0x45c   :  { %v777_v29 = vpop.f32.mrb[14].mxu0 }
 0x45d   :  { %v1084_v30 = vpack.c.bf16 %v1077_v27, %v1076_v26  ;;  %v1736_v31 = vpop.f32.mrb[15].mxu0 }
 0x45f   :  { %1776 = vmatmul.mubr.msk.bf16.vlgmr.msra.gmra.mrb[40].mxu1 %vm213_vm2, %v1084_v30 }
 0x460   :  { %1787 = vmatprep.mubr.msk.bf16.mxu1 %vm1916_vm1, %v1915_v9  ;;  %1786 = vmatpush3.bf16.msra.mxu1 %v1190_v33 }
 0x461   :  { %1797 = vmatprep.subr.bf16.mxu1 %v1915_v9 }
 0x476   :  { %v659_v34 = vpop.xlane.xlu0 %658 }
 0x477   :  { %1871 = vrcp.f32 %v659_v34 }
 0x47a   :  { %v662_v35 = vpop.xlane.xlu0 %661 }
 0x47b   :  { %1873 = vrcp.f32 %v662_v35 }
 0x480   :  { %v668_v62 = vpop.xlane.xlu1 %667 }
 0x481   :  { %v1872_v39 = vpop.eup %1871  ;;  %1875 = vrcp.f32 %v668_v62  ;;  %v1837_v62 = vld [vmem:[%s2337_s9] sm:$0xff]  }
 0x485   :  { %v1874_v57 = vpop.eup %1873 }
 0x488   :  { %v674_v2 = vpop.xlane.xlu1 %673 }
 0x48b   :  { %v1876_v5 = vpop.eup %1875 }
 0x4af   :  { %v665_v63 = vpop.xlane.xlu0 %664 }
 0x4b0   :  { %1877 = vrcp.f32 %v665_v63  ;;  %v1838_v63 = vld [vmem:[%s2337_s9 + $0x8] sm:$0xff]  }
 0x4b1   :  { %1879 = vrcp.f32 %v674_v2 }
 0x4b3   :  { %v671_v3 = vpop.xlane.xlu0 %670 }
 0x4b4   :  { %1881 = vrcp.f32 %v671_v3 }
 0x4ba   :  { %v1878_v6 = vpop.eup %1877 }
 0x4bb   :  { %v1880_v55 = vpop.eup %1879 }
 0x4bd   :  { %v822_v36 = vpop.f32.mrb[28].mxu1 }
 0x4be   :  { %v1741_v37 = vpop.f32.mrb[29].mxu1  ;;  %v1078_v43 = vmul.f32 %v1872_v39, %v822_v36  ;;  %v1882_v4 = vpop.eup %1881 }
 0x4bf   :  { %v825_v38 = vpop.f32.mrb[30].mxu1 }
 0x4c0   :  { %v1742_v40 = vpop.f32.mrb[31].mxu1 }
 0x4c1   :  { %v870_v41 = vpop.f32.mrb[16].mxu0 }
 0x4c2   :  { %v1079_v44 = vmul.f32 %v1874_v57, %v870_v41  ;;  %v1747_v45 = vpop.f32.mrb[17].mxu0 }
 0x4c3   :  { %v873_v46 = vpop.f32.mrb[18].mxu0 }
 0x4c4   :  { %v1085_v47 = vpack.c.bf16 %v1079_v44, %v1078_v43  ;;  %v1748_v48 = vpop.f32.mrb[19].mxu0  ;;  %v1598_v43 = vld [vmem:[%s2334_s6] ss:$0 sm:$0xff]  ;;  %s1561_s6 = sshll.u32 %s1922_s29, 4  ;;  %s1562_s6 = int_to_ptr.vmem [resolvable:$true] %s1561_s6 }
 0x4c5   :  { %s1891_s30 = scalar_lea.vmem %s1562_s6, 256  ;;  %p1896_p1 = scmp.lt.s32.totalorder %s1562_s6, %s1562_s6 }
 0x4c6   :  { %1782 = vmatmul.mubr.msk.bf16.vlgmr.msra.gmra.mrb[28].mxu0 %vm213_vm2, %v1085_v47  ;;  %p1892_p0 = scmp.ne.s32.totalorder %s1562_s6, %s1891_s30  ;;  %p1897_p2 = scmp.lt.s32.totalorder %s1891_s30, %s1891_s30 }
 0x4c7   :  { %1792 = vmatpush3.bf16.msra.mxu0 %v1237_v49  ;;  %1793 = vmatprep.mubr.msk.bf16.mxu0 %vm1916_vm1, %v1915_v9 }
 0x4c8   :  { %1805 = vmatprep.subr.bf16.mxu0 %v1915_v9  ;;  %p1898_p3 = por %p1897_p2, %p1896_p1 }
 0x4c9   :  { %v966_v50 = vpop.f32.mrb[20].mxu0 }
 0x4ca   :  { %v1759_v51 = vpop.f32.mrb[21].mxu0  ;;  %v1081_v8 = vmul.f32 %v1876_v5, %v966_v50  ;;  %p1899_p4 = pnand %p1898_p3, %p1892_p0 }
 0x4cb   :  { %v969_v52 = vpop.f32.mrb[22].mxu0 }
 0x4cc   :  { %v1760_v54 = vpop.f32.mrb[23].mxu0 }
 0x4d1   :  { %v1062_v56 = vpop.f32.mrb[24].mxu0 }
 0x4d2   :  { %v1771_v58 = vpop.f32.mrb[25].mxu0  ;;  %v1083_v16 = vmul.f32 %v1880_v55, %v1062_v56 }
 0x4d3   :  { %v1065_v59 = vpop.f32.mrb[26].mxu0 }
 0x4d4   :  { %v1772_v60 = vpop.f32.mrb[27].mxu0 }
 0x4f6   :  { %v918_v7 = vpop.f32.mrb[32].mxu1 }
 0x4f7   :  { %v1080_v10 = vmul.f32 %v1878_v6, %v918_v7  ;;  %v1753_v11 = vpop.f32.mrb[33].mxu1 }
 0x4f8   :  { %v921_v12 = vpop.f32.mrb[34].mxu1 }
 0x4f9   :  { %v1086_v13 = vpack.c.bf16 %v1081_v8, %v1080_v10  ;;  %v1754_v14 = vpop.f32.mrb[35].mxu1 }
 0x4fb   :  { %1788 = vmatmul.mubr.msk.bf16.vlgmr.msra.gmra.mrb[44].mxu1 %vm213_vm2, %v1086_v13 }
 0x4fc   :  { %1801 = vmatprep.mubr.msk.bf16.mxu1 %vm1916_vm1, %v1915_v9  ;;  %1798 = vmatpush3.bf16.msra.mxu1 %v1837_v62 }
 0x4fd   :  { %1799 = vmatprep.subr.bf16.mxu1 %v1915_v9 }
 0x4fe   :  { %v1014_v15 = vpop.f32.mrb[36].mxu1 }
 0x4ff   :  { %v1082_v17 = vmul.f32 %v1882_v4, %v1014_v15  ;;  %v1765_v18 = vpop.f32.mrb[37].mxu1 }
 0x500   :  { %v1017_v19 = vpop.f32.mrb[38].mxu1  ;;  %1800 = vmatpush3.bf16.msra.mxu1 %v1838_v63  ;;  %v1599_v18 = vld [vmem:[%s2335_s7] ss:$0 sm:$0xff] }
 0x501   :  { %v1087_v20 = vpack.c.bf16 %v1083_v16, %v1082_v17  ;;  %v1766_v21 = vpop.f32.mrb[39].mxu1  ;;  %v1605_v63 = vld [vmem:[%s2340_s12] ss:$0 sm:$0xff] }
 0x503   :  { %1794 = vmatmul.mubr.msk.bf16.vlgmr.msra.gmra.mrb[32].mxu0 %vm213_vm2, %v1087_v20 }
 0x504   :  { %1821 = vmatprep.mubr.msk.bf16.mxu0 %vm1916_vm1, %v1915_v9 }
 0x532   :  { %v1132_v22 = vpop.f32.mrb[40].mxu1 }
 0x533   :  { %v1777_v23 = vpop.f32.mrb[41].mxu1  ;;  %v1280_v25 = vsel %vm50_vm0, %v1132_v22, 0.0 }
 0x534   :  { %v1135_v24 = vpop.f32.mrb[42].mxu1 }
 0x535   :  { %v1778_v53 = vpop.f32.mrb[43].mxu1  ;;  %v1287_v30 = vsel %vm50_vm0, %v1135_v24, 0.0  ;;  %v1600_v24 = vld [vmem:[%s2336_s8] ss:$0 sm:$0xff] }
 0x599   :  { %v1179_v61 = vpop.f32.mrb[28].mxu0 }
 0x59a   :  { %v1281_v26 = vsel %vm50_vm0, %v1179_v61, 0.0  ;;  %v1783_v27 = vpop.f32.mrb[29].mxu0 }
 0x59b   :  { %v1282_v28 = vadd.f32 %v1281_v26, %v1280_v25  ;;  %v1182_v29 = vpop.f32.mrb[30].mxu0  ;;  %v1839_v27 = vld [vmem:[%s2339_s11] sm:$0xff]  }
 0x59c   :  { %v1288_v31 = vsel %vm50_vm0, %v1182_v29, 0.0  ;;  %v1784_v32 = vpop.f32.mrb[31].mxu0  ;;  %1806 = vmatpush3.bf16.msra.mxu0 %v1839_v27  ;;  %v1841_v29 = vld [vmem:[%s2339_s11 + $0x10] sm:$0xff]  }
 0x59d   :  { %v1289_v33 = vadd.f32 %v1288_v31, %v1287_v30  ;;  %1807 = vmatprep.subr.bf16.mxu0 %v1915_v9  ;;  %v1842_v30 = vld [vmem:[%s2339_s11 + $0x18] sm:$0xff]   ;;  %v1843_v31 = vld [vmem:[%s2339_s11 + $0x20] sm:$0xff]   ;;  %v1844_v32 = vld [vmem:[%s2339_s11 + $0x28] sm:$0xff]  }
 0x5ce   :  { %v1226_v34 = vpop.f32.mrb[44].mxu1 }
 0x5cf   :  { %v1283_v35 = vsel %vm50_vm0, %v1226_v34, 0.0  ;;  %v1789_v36 = vpop.f32.mrb[45].mxu1  ;;  %v1846_v34 = vld [vmem:[%s2339_s11 + $0x38] sm:$0xff]  }
 0x5d0   :  { %v1284_v37 = vadd.f32 %v1283_v35, %v1282_v28  ;;  %v1229_v38 = vpop.f32.mrb[46].mxu1  ;;  %v1840_v28 = vld [vmem:[%s2339_s11 + $0x8] sm:$0xff]   ;;  %v1601_v35 = vld [vmem:[%s2338_s10] ss:$0 sm:$0xff] }
 0x5d1   :  { %v1290_v39 = vsel %vm50_vm0, %v1229_v38, 0.0  ;;  %v1790_v40 = vpop.f32.mrb[47].mxu1  ;;  %1808 = vmatpush3.bf16.msra.mxu0 %v1840_v28 }
 0x5d2   :  { %v1291_v57 = vadd.f32 %v1290_v39, %v1289_v33  ;;  %1809 = vmatprep.subr.bf16.mxu0 %v1915_v9  ;;  %v1845_v33 = vld [vmem:[%s2339_s11 + $0x30] sm:$0xff]  }
 0x5d5   :  { %1810 = vmatpush3.bf16.msra.mxu0 %v1841_v29 }
 0x5d6   :  { %v1273_v41 = vpop.f32.mrb[32].mxu0  ;;  %1811 = vmatprep.subr.bf16.mxu0 %v1915_v9 }
 0x5d7   :  { %v1285_v42 = vsel %vm50_vm0, %v1273_v41, 0.0  ;;  %v1795_v44 = vpop.f32.mrb[33].mxu0 }
 0x5d8   :  { %v1286_v45 = vadd.f32 %v1285_v42, %v1284_v37  ;;  %v1276_v46 = vpop.f32.mrb[34].mxu0 }
 0x5d9   :  { %v1292_v47 = vsel %vm50_vm0, %v1276_v46, 0.0  ;;  %v1796_v48 = vpop.f32.mrb[35].mxu0  ;;  %1812 = vmatpush3.bf16.msra.mxu0 %v1842_v30 }
 0x5da   :  { %v1301_v49 = vadd.f32 %v1598_v43, %v1286_v45  ;;  %v1293_v50 = vadd.f32 %v1292_v47, %v1291_v57  ;;  %1813 = vmatprep.subr.bf16.mxu0 %v1915_v9 }
 0x5dc   :  { %v2244_v51 = vadd.f32 %v1301_v49, %v1998_v0  ;;  %v1302_v52 = vadd.f32 %v1598_v43, %v1293_v50 }
 0x5dd   :  { %1814 = vmatpush3.bf16.msra.mxu0 %v1843_v31 }
 0x5de   :  { %v2247_v54 = vadd.f32 %v1302_v52, %v2003_v1  ;;  %v1307_v56 = vsel %vm50_vm0, %v2244_v51, 0.0  ;;  %v1315_v58 = vmul.f32 %v2244_v51, %v2244_v51  ;;  %1815 = vmatprep.subr.bf16.mxu0 %v1915_v9 }
 0x5df   :  { %1308 = vadd.xlane.f32.xlu0 %v1307_v56 }
 0x5e0   :  { %v1310_v59 = vsel %vm50_vm0, %v2247_v54, 0.0  ;;  %v1316_v60 = vmul.f32 %v2247_v54, %v2247_v54  ;;  %v1317_v0 = vsel %vm50_vm0, %v1315_v58, 0.0 }
 0x5e1   :  { %1311 = vadd.xlane.f32.xlu1 %v1310_v59  ;;  %1816 = vmatpush3.bf16.msra.mxu0 %v1844_v32 }
 0x5e2   :  { %v1320_v1 = vsel %vm50_vm0, %v1316_v60, 0.0  ;;  %1817 = vmatprep.subr.bf16.mxu0 %v1915_v9 }
 0x5e3   :  { %1318 = vadd.xlane.f32.xlu0 %v1317_v0 }
 0x5e5   :  { %1321 = vadd.xlane.f32.xlu1 %v1320_v1  ;;  %1818 = vmatpush3.bf16.msra.mxu0 %v1845_v33 }
 0x5e6   :  { %1819 = vmatprep.subr.bf16.mxu0 %v1915_v9 }
 0x5e9   :  { %1820 = vmatpush3.bf16.msra.mxu0 %v1846_v34 }
 0x66c   :  { %v1309_v2 = vpop.xlane.xlu0 %1308 }
 0x66d   :  { %v1313_v3 = vmul.f32 0.03125, %v1309_v2 }
 0x66e   :  { %v1312_v5 = vpop.xlane.xlu1 %1311 }
 0x66f   :  { %v1314_v6 = vmul.f32 0.03125, %v1312_v5  ;;  %v1325_v8 = vmul.f32 %v1313_v3, %v1313_v3  ;;  %v1329_v16 = vsub.f32 %v2244_v51, %v1313_v3 }
 0x670   :  { %v1319_v7 = vpop.xlane.xlu0 %1318 }
 0x671   :  { %v1323_v10 = vmul.f32 0.03125, %v1319_v7  ;;  %v1326_v12 = vmul.f32 %v1314_v6, %v1314_v6  ;;  %v1330_v19 = vsub.f32 %v2247_v54, %v1314_v6 }
 0x672   :  { %v1322_v11 = vpop.xlane.xlu1 %1321 }
 0x673   :  { %v1327_v13 = vsub.f32 %v1323_v10, %v1325_v8  ;;  %v1324_v14 = vmul.f32 0.03125, %v1322_v11 }
 0x675   :  { %v1331_v55 = vadd.f32 1e-05, %v1327_v13  ;;  %v1328_v4 = vsub.f32 %v1324_v14, %v1326_v12 }
 0x677   :  { %1883 = vrsqrt.f32 %v1331_v55  ;;  %v1332_v15 = vadd.f32 1e-05, %v1328_v4 }
 0x679   :  { %1885 = vrsqrt.f32 %v1332_v15 }
 0x681   :  { %v1884_v17 = vpop.eup %1883 }
 0x682   :  { %v1335_v20 = vmul.f32 %v1884_v17, %v1329_v16 }
 0x683   :  { %v1886_v21 = vpop.eup %1885 }
 0x684   :  { %v1343_v22 = vmul.f32 %v1599_v18, %v1335_v20  ;;  %v1336_v23 = vmul.f32 %v1886_v21, %v1330_v19 }
 0x686   :  { %v1344_v53 = vmul.f32 %v1599_v18, %v1336_v23  ;;  %v1351_v61 = vadd.f32 %v1600_v24, %v1343_v22 }
 0x688   :  { %v1352_v25 = vadd.f32 %v1600_v24, %v1344_v53 }
 0x68a   :  { %v1353_v26 = vpack.c.bf16 %v1352_v25, %v1351_v61 }
 0x68c   :  { %1802 = vmatmul.mubr.msk.bf16.vlgmr.msra.gmra.mrb[48].mxu1 %vm50_vm0, %v1353_v26 }
 0x75f   :  { %v1414_v36 = vpop.f32.mrb[48].mxu1 }
 0x760   :  { %v1415_v37 = vadd.f32 %v1601_v35, %v1414_v36  ;;  %v1803_v38 = vpop.f32.mrb[49].mxu1 }
 0x761   :  { %v1417_v39 = vpop.f32.mrb[50].mxu1 }
 0x762   :  { %v1423_v40 = vmul.f32 %v1415_v37, %v1415_v37  ;;  %v1418_v57 = vadd.f32 %v1601_v35, %v1417_v39  ;;  %v1804_v41 = vpop.f32.mrb[51].mxu1  ;;  %v1421_v58 = vmul.f32 0.5, %v1415_v37 }
 0x764   :  { %v1425_v42 = vmul.f32 %v1423_v40, %v1415_v37  ;;  %v1424_v43 = vmul.f32 %v1418_v57, %v1418_v57  ;;  %v1422_v59 = vmul.f32 0.5, %v1418_v57 }
 0x766   :  { %v1427_v44 = vmul.f32 0.044715, %v1425_v42  ;;  %v1426_v45 = vmul.f32 %v1424_v43, %v1418_v57 }
 0x768   :  { %v1429_v46 = vadd.f32 %v1427_v44, %v1415_v37  ;;  %v1428_v47 = vmul.f32 0.044715, %v1426_v45 }
 0x76a   :  { %v1431_v48 = vmul.f32 0.7978846, %v1429_v46  ;;  %v1430_v9 = vadd.f32 %v1428_v47, %v1418_v57 }
 0x76c   :  { %1887 = vtanh.f32 %v1431_v48  ;;  %v1432_v49 = vmul.f32 0.7978846, %v1430_v9 }
 0x76e   :  { %1889 = vtanh.f32 %v1432_v49 }
 0x776   :  { %v1888_v50 = vpop.eup %1887 }
 0x777   :  { %v1435_v52 = vadd.f32 1.0, %v1888_v50 }
 0x778   :  { %v1890_v56 = vpop.eup %1889 }
 0x779   :  { %v1436_v60 = vadd.f32 1.0, %v1890_v56  ;;  %v1437_v0 = vmul.f32 %v1435_v52, %v1421_v58 }
 0x77b   :  { %v1438_v1 = vmul.f32 %v1436_v60, %v1422_v59 }
 0x77d   :  { %v1439_v62 = vpack.c.bf16 %v1438_v1, %v1437_v0 }
 0x77f   :  { %1822 = vmatmul.mubr.bf16.vlgmr.msra.gmra.mrb[36].mxu0 %v1439_v62 }
 0x852   :  { %v1545_v2 = vpop.f32.mrb[36].mxu0 }
 0x853   :  { %v1546_v3 = vadd.f32 %v1605_v63, %v1545_v2  ;;  %v1823_v5 = vpop.f32.mrb[37].mxu0 }
 0x854   :  { %v1548_v6 = vpop.f32.mrb[38].mxu0 }
 0x855   :  { %v1552_v7 = vadd.f32 %v1546_v3, %v2244_v51  ;;  %v1549_v8 = vadd.f32 %v1605_v63, %v1548_v6  ;;  %v1824_v10 = vpop.f32.mrb[39].mxu0 }
 0x857   :  { %1554 = vst.msk [vmem:[#allocation2] sm:$0xff] %vm50_vm0, %v1552_v7  ;;  %v1553_v11 = vadd.f32 %v1549_v8, %v2247_v54 }
 0x859   :  { %1555 = vst.msk [vmem:[#allocation2 + $0x8] sm:$0xff] %vm50_vm0, %v1553_v11 }
 0x85a   :  { %1902 = shalt.err (!%p1899_p4)
}
 0x85b   :  { %s1903_s3 = scalar_lea.hbm %s2341_s13, 256 }
 0x85c   :  { %p1904_p5 = scmp.ne.s32.totalorder %s2341_s13, %s1903_s3  ;;  %p1907_p6 = scmp.lt.u32.totalorder %s1903_s3, %s2341_s13 }
 0x85e   :  { %p1909_p7 = pnand %p1907_p6, %p1904_p5 }
 0x860   :  { %1912 = shalt.err (!%p1909_p7)
}
 0x861   :  { %s1923_s18 = smov 128   ;;  %s1924_s1 = smov 8  }
 0x862   :  { %1567 = dma.vmem_to_hbm [thread:$0]  %s1562_s6, 256, %s2341_s13, [#allocation3], %s1923_s18, %s1923_s18, %s1924_s1  }
 0x863   :  { %1913 = dma.done.wait [#allocation3], 256  }
 0x864   :  { %1914 = vsyncadd [#allocation3], 4294967040 }
 0x865   :  { %1571 = vsyncpa [#allocation3], 1 }

</bundles_post_ra>
